<compile_context>
chip_gen: v7x
topology: tpu7x:2x2x1
jax: 0.10.0
libtpu: 0.0.40
codegen_flags: <defaults>
</compile_context>

<pallas_src>
import functools
import math

import numpy as np
import jax
import jax.numpy as jnp
from jax import lax
from jax.experimental import pallas as pl
from jax.experimental.pallas import tpu as pltpu


def _skeleton_conv_kernel(x_ref, w_ref, b_ref, o_ref, *, stride, kernel_size, t_blk):
    """Masked skeleton conv1d, NCT layout, time on the lane (last) axis.

    x_ref : (1, C_in, T_pad)   full time axis for one batch element
                               (block index constant over the inner T-tile axis,
                                so it is DMA'd once per batch element)
    w_ref : (C_out, K*C_in)    mask-folded, im2col-ordered weights (resident)
    b_ref : (C_out, 1)         bias column, f32 (resident)
    o_ref : (1, C_out, t_blk)  lane-dense output tile
    """
    c_in = x_ref.shape[1]

    # Element offset of this output tile's receptive field in the padded input.
    t0 = pl.multiple_of(pl.program_id(1) * (t_blk * stride), t_blk * stride)
    win = (t_blk - 1) * stride + kernel_size
    x_win = x_ref[0, :, pl.ds(t0, win)]                       # (C_in, win)

    # im2col: row k*C_in + c  ->  x[c, t*stride + k], matching w_ref's layout.
    taps = [
        lax.slice(x_win, (0, k), (c_in, k + (t_blk - 1) * stride + 1), (1, stride))
        for k in range(kernel_size)
    ]                                                          # K x (C_in, t_blk)
    xcol = jnp.concatenate(taps, axis=0)                       # (K*C_in, t_blk)

    acc = jnp.dot(w_ref[...], xcol, preferred_element_type=jnp.float32)  # (C_out, t_blk)
    acc = acc + b_ref[...]                                     # (C_out, 1) broadcast over T
    o_ref[0] = acc.astype(o_ref.dtype)


def _pick_t_block(t_out, target=512):
    """Largest T tile that keeps lane-dense stores and divides T_out evenly."""
    if t_out % 128 != 0 or t_out <= target:
        return t_out                       # full-extent block (always legal)
    for cand in (target, 512, 384, 256, 128):
        if cand % 128 == 0 and cand <= t_out and t_out % cand == 0:
            return cand
    return t_out


class SkeletonConvolution:
    """JAX/Pallas re-implementation of moai SkeletonConvolution forward pass."""

    def __init__(self, in_channels, out_channels, kernel_size, stride=1, bias=True,
                 padding=0, padding_mode="zeros", neighbors=(), key=None):
        self.joint_num = len(neighbors)
        assert in_channels % self.joint_num == 0
        assert out_channels % self.joint_num == 0
        self.in_channels = in_channels
        self.out_channels = out_channels
        self.in_per = in_channels // self.joint_num
        self.out_per = out_channels // self.joint_num
        self.kernel_size = kernel_size
        self.stride = stride
        self.padding = padding
        self.padding_mode = "constant" if padding_mode == "zeros" else padding_mode
        self.has_bias = bias

        # expanded neighbor channel indices (same as the PyTorch module)
        expanded = []
        for nb in neighbors:
            e = []
            for k in nb:
                for i in range(self.in_per):
                    e.append(k * self.in_per + i)
            expanded.append(e)

        # mask buffer
        mask = np.zeros((out_channels, in_channels, kernel_size), np.float32)
        for i, e in enumerate(expanded):
            mask[self.out_per * i:self.out_per * (i + 1), e, :] = 1.0

        # deterministic kaiming-uniform(a=sqrt(5))-style per-block init
        if key is None:
            key = jax.random.PRNGKey(0)
        weight = np.zeros((out_channels, in_channels, kernel_size), np.float32)
        bias_v = np.zeros((out_channels,), np.float32)
        for i, e in enumerate(expanded):
            fan_in = len(e) * kernel_size
            w_bound = 1.0 / math.sqrt(fan_in)       # kaiming_uniform with a=sqrt(5)
            kw = jax.random.fold_in(key, 2 * i)
            blk = jax.random.uniform(kw, (self.out_per, len(e), kernel_size),
                                     minval=-w_bound, maxval=w_bound)
            weight[self.out_per * i:self.out_per * (i + 1), e, :] = np.asarray(blk)
            if bias:
                b_bound = 1.0 / math.sqrt(fan_in)
                kb = jax.random.fold_in(key, 2 * i + 1)
                bias_v[self.out_per * i:self.out_per * (i + 1)] = np.asarray(
                    jax.random.uniform(kb, (self.out_per,), minval=-b_bound, maxval=b_bound)
                )

        self.weight = jnp.asarray(weight)           # kept for the reference check
        self.mask = jnp.asarray(mask)

        # Fold the static mask into the weight ONCE and pre-flatten to the
        # im2col layout: w_flat[o, k*C_in + c] = (weight*mask)[o, c, k]
        masked = weight * mask
        w_flat = np.transpose(masked, (0, 2, 1)).reshape(
            out_channels, kernel_size * in_channels)
        self.w_flat = jnp.asarray(np.ascontiguousarray(w_flat))
        self.bias_col = jnp.asarray(bias_v).reshape(out_channels, 1)  # zeros if bias=False

    def __call__(self, x, *, t_block=None):
        # x: (N, C_in, T)  -- PyTorch conv1d layout, kept end-to-end (no transposes).
        jnp_mode = {"constant": "constant", "reflect": "reflect",
                    "replicate": "edge", "circular": "wrap"}[self.padding_mode]
        xp = jnp.pad(x, ((0, 0), (0, 0), (self.padding, self.padding)), mode=jnp_mode)
        n, c_in, t_pad = xp.shape
        t_out = (t_pad - self.kernel_size) // self.stride + 1

        t_blk = _pick_t_block(t_out) if t_block is None else t_block
        assert t_out % t_blk == 0, (t_out, t_blk)
        num_t = t_out // t_blk

        w = self.w_flat.astype(x.dtype)   # bf16 in -> bf16 MXU operands; f32 no-op
        b = self.bias_col                 # bias add / accumulation stay f32

        kernel = functools.partial(
            _skeleton_conv_kernel, stride=self.stride,
            kernel_size=self.kernel_size, t_blk=t_blk)

        flops = 2 * n * t_out * self.out_channels * self.in_channels * self.kernel_size
        bytes_accessed = int(
            xp.size * xp.dtype.itemsize + w.size * w.dtype.itemsize
            + b.size * b.dtype.itemsize
            + n * self.out_channels * t_out * xp.dtype.itemsize)

        out = pl.pallas_call(
            kernel,
            out_shape=jax.ShapeDtypeStruct((n, self.out_channels, t_out), x.dtype),
            grid=(n, num_t),
            in_specs=[
                # full T per batch element; block index constant over inner axis
                pl.BlockSpec((1, c_in, t_pad), lambda ni, ti: (ni, 0, 0)),
                # resident mask-folded weights / bias
                pl.BlockSpec((self.out_channels, self.kernel_size * self.in_channels),
                             lambda ni, ti: (0, 0)),
                pl.BlockSpec((self.out_channels, 1), lambda ni, ti: (0, 0)),
            ],
            out_specs=pl.BlockSpec((1, self.out_channels, t_blk),
                                   lambda ni, ti: (ni, 0, ti)),
            compiler_params=pltpu.CompilerParams(
                dimension_semantics=("parallel", "parallel")),
            cost_estimate=pl.CostEstimate(flops=flops, transcendentals=0,
                                          bytes_accessed=bytes_accessed),
        )(xp, w, b)
        return out                                   # (N, C_out, T_out)


def _reference(module: SkeletonConvolution, x):
    """Pure-JAX reference (lax.conv_general_dilated) matching torch conv1d."""
    jnp_mode = {"constant": "constant", "reflect": "reflect",
                "replicate": "edge", "circular": "wrap"}[module.padding_mode]
    xp = jnp.pad(x, ((0, 0), (0, 0), (module.padding, module.padding)), mode=jnp_mode)
    w = module.weight * module.mask
    out = lax.conv_general_dilated(
        xp, w, window_strides=(module.stride,), padding=[(0, 0)],
        dimension_numbers=("NCH", "OIH", "NCH"))
    return out + module.bias_col.reshape(1, -1, 1)


if __name__ == "__main__":
    # skeleton with 4 joints; 3 input channels / joint, 4 output channels / joint
    neighbors = [[0, 1], [0, 1, 2], [1, 2, 3], [2, 3]]
    in_channels, out_channels = 12, 16
    kernel_size, padding = 3, 1
    N, T = 2, 256

    key = jax.random.PRNGKey(0)
    k_x, k_w = jax.random.split(key)
    x = jax.random.normal(k_x, (N, in_channels, T), dtype=jnp.float32)

    # Case 1: stride=1, two 128-wide T tiles (exercises the halo'd window slicing).
    conv1 = SkeletonConvolution(in_channels, out_channels, kernel_size,
                                stride=1, bias=True, padding=padding,
                                padding_mode="zeros", neighbors=neighbors, key=k_w)
    out1 = jax.block_until_ready(conv1(x, t_block=128))
    ref1 = jax.block_until_ready(_reference(conv1, x))
    assert out1.shape == ref1.shape, (out1.shape, ref1.shape)
    assert np.allclose(np.asarray(out1), np.asarray(ref1), atol=1e-4, rtol=1e-4)

    # Case 2: stride=2, single full-extent T tile.
    conv2 = SkeletonConvolution(in_channels, out_channels, kernel_size,
                                stride=2, bias=True, padding=padding,
                                padding_mode="zeros", neighbors=neighbors, key=k_w)
    out2 = jax.block_until_ready(conv2(x))
    ref2 = jax.block_until_ready(_reference(conv2, x))
    assert out2.shape == ref2.shape, (out2.shape, ref2.shape)
    assert np.allclose(np.asarray(out2), np.asarray(ref2), atol=1e-4, rtol=1e-4)

    print("KERNEL_OK")
</pallas_src>

<mosaic_0001>
module attributes {stable_mosaic.version = 11 : i64} {
  func.func @_skeleton_conv_kernel(%arg0: i32, %arg1: i32, %arg2: memref<1x12x258xf32, #tpu.memory_space<vmem>>, %arg3: memref<16x36xf32, #tpu.memory_space<vmem>>, %arg4: memref<16x1xf32, #tpu.memory_space<vmem>>, %arg5: memref<1x16x128xf32, #tpu.memory_space<vmem>>) attributes {dimension_semantics = [#tpu.dimension_semantics<parallel>, #tpu.dimension_semantics<parallel>], iteration_bounds = array<i64: 2, 2>, scalar_prefetch = 0 : i64, scratch_operands = 0 : i64, tpu.core_type = #tpu.core_type<tc>, window_params = [{transform_indices = @transform_0, window_bounds = array<i64: 1, 12, 258>}, {pipeline_mode = #tpu.pipeline_mode<synchronous>, transform_indices = @transform_1, window_bounds = array<i64: 16, 36>}, {pipeline_mode = #tpu.pipeline_mode<synchronous>, transform_indices = @transform_2, window_bounds = array<i64: 16, 1>}, {transform_indices = @transform_3, window_bounds = array<i64: 1, 16, 128>}]} {
    %c128_i32 = arith.constant 128 : i32
    %0 = arith.muli %arg1, %c128_i32 : i32
    %1 = tpu.assume_multiple %0, 128 : i32
    %c0 = arith.constant 0 : index
    %c0_0 = arith.constant 0 : index
    %2 = arith.index_cast %1 : i32 to index
    %3 = vector.load %arg2[%c0, %c0_0, %2] : memref<1x12x258xf32, #tpu.memory_space<vmem>>, vector<1x12x130xf32>
    %4 = vector.shape_cast %3 : vector<1x12x130xf32> to vector<12x130xf32>
    %5 = vector.extract_strided_slice %4 {offsets = [0, 0], sizes = [12, 128], strides = [1, 1]} : vector<12x130xf32> to vector<12x128xf32>
    %6 = vector.extract_strided_slice %4 {offsets = [0, 1], sizes = [12, 128], strides = [1, 1]} : vector<12x130xf32> to vector<12x128xf32>
    %7 = vector.extract_strided_slice %4 {offsets = [0, 2], sizes = [12, 128], strides = [1, 1]} : vector<12x130xf32> to vector<12x128xf32>
    %8 = tpu.concatenate %5, %6, %7 in 0 : vector<12x128xf32>, vector<12x128xf32>, vector<12x128xf32> -> vector<36x128xf32>
    %c0_1 = arith.constant 0 : index
    %c0_2 = arith.constant 0 : index
    %9 = vector.load %arg3[%c0_1, %c0_2] : memref<16x36xf32, #tpu.memory_space<vmem>>, vector<16x36xf32>
    %cst = arith.constant dense<0.000000e+00> : vector<16x128xf32>
    %10 = tpu.matmul %9, %8, %cst {dimension_numbers = #tpu.dot_dimension_numbers<[1], [0], [0], [1], [0, 0, 1, 1], [], []>} : vector<16x36xf32>, vector<36x128xf32>, vector<16x128xf32> -> vector<16x128xf32>
    %c0_3 = arith.constant 0 : index
    %c0_4 = arith.constant 0 : index
    %11 = vector.load %arg4[%c0_3, %c0_4] : memref<16x1xf32, #tpu.memory_space<vmem>>, vector<16x1xf32>
    %12 = vector.broadcast %11 : vector<16x1xf32> to vector<16x128xf32>
    %13 = arith.addf %10, %12 : vector<16x128xf32>
    %c0_5 = arith.constant 0 : index
    %c0_6 = arith.constant 0 : index
    %c0_7 = arith.constant 0 : index
    %14 = vector.load %arg5[%c0_5, %c0_6, %c0_7] : memref<1x16x128xf32, #tpu.memory_space<vmem>>, vector<1x16x128xf32>
    %15 = vector.shape_cast %14 : vector<1x16x128xf32> to vector<16x128xf32>
    %16 = vector.shape_cast %13 : vector<16x128xf32> to vector<1x16x128xf32>
    tpu.vector_store %arg5[%c0_5, %c0_6, %c0_7], %16 {strides = array<i32>} : memref<1x16x128xf32, #tpu.memory_space<vmem>>, vector<1x16x128xf32>,
    return
  }
  func.func @transform_0(%arg0: i32, %arg1: i32) -> (i32, i32, i32) {
    %c0_i32 = arith.constant 0 : i32
    %c0_i32_0 = arith.constant 0 : i32
    %c0_i32_1 = arith.constant 0 : i32
    return %arg0, %c0_i32, %c0_i32_0 : i32, i32, i32
  }
  func.func @transform_1(%arg0: i32, %arg1: i32) -> (i32, i32) {
    %c0_i32 = arith.constant 0 : i32
    %c0_i32_0 = arith.constant 0 : i32
    %c0_i32_1 = arith.constant 0 : i32
    return %c0_i32, %c0_i32_0 : i32, i32
  }
  func.func @transform_2(%arg0: i32, %arg1: i32) -> (i32, i32) {
    %c0_i32 = arith.constant 0 : i32
    %c0_i32_0 = arith.constant 0 : i32
    %c0_i32_1 = arith.constant 0 : i32
    return %c0_i32, %c0_i32_0 : i32, i32
  }
  func.func @transform_3(%arg0: i32, %arg1: i32) -> (i32, i32, i32) {
    %c0_i32 = arith.constant 0 : i32
    %c0_i32_0 = arith.constant 0 : i32
    return %arg0, %c0_i32, %arg1 : i32, i32, i32
  }
}

</mosaic_0001>

<bundles_post_ra>
// kernel: tpu_custom_call.1
= control target key start
LH: loop header
LB: loop body
LE: loop exit
PB: predicated region body
PF: predicated region fallthrough
CT: control target
= control target key end

     0   :  { %8 = vsyncpa [#allocation3], 0  ;;  %s842_s0 = inlined_call_operand.vmem [shape: f32[2,12,258], index: 0, kind: input, shape index: {}]   ;;  %s843_s1 = inlined_call_operand.vmem [shape: f32[16,36], index: 1, kind: input, shape index: {}]   ;;  %s844_s2 = inlined_call_operand.vmem [shape: f32[16,1], index: 2, kind: input, shape index: {}]   ;;  %s845_s3 = inlined_call_operand.hbm [shape: f32[2,16,256], index: 3, kind: output, shape index: {}]  }
   0x1   :  { %10 = vsyncpa [#allocation3 + $0x1], 0  ;;  %s684_s12 = smov 0   ;;  %s686_s13 = smov 0  }
   0x2   :  { %s688_s14 = smov 0   ;;  %s690_s15 = smov 0  }
   0x3   :  { %s692_s16 = smov 0   ;;  %s694_s17 = smov 0  }
   0x4   :  { %s696_s18 = smov 0   ;;  %s698_s19 = smov 0  }
   0x5 LB: > { %s421_s20 = sadd.s32 4294967295, %s655_s19   ;;  %s422_s21 = sadd.s32 4294967294, %s655_s19   ;;  %s655_s19 = sphi %s698_s19, %s16_s19   ;;  %s651_s18 = sphi %s696_s18, %s854_s18   ;;  %s647_s17 = sphi %s694_s17, %s853_s17   ;;  %s643_s16 = sphi %s692_s16, %s852_s16   ;;  %s639_s15 = sphi %s690_s15, %s851_s15   ;;  %s635_s14 = sphi %s688_s14, %s850_s14   ;;  %s631_s13 = sphi %s686_s13, %s849_s13   ;;  %s627_s12 = sphi %s684_s12, %s848_s12  }
   0x6   : > { %s25_s22 = sadd.s32 1, %s647_s17  ;;  %s28_s23 = sadd.s32 1, %s651_s18 }
   0x7   : > { %p26_p0 = scmp.ge.s32.totalorder %s25_s22, 2  ;;  %p115_p1 = scmp.ne.s32.totalorder %s635_s14, %s631_s13 }
   0x8   : > { %p116_p2 = scmp.eq.s32.totalorder %s421_s20, 3  ;;  %p121_p5 = scmp.ne.s32.totalorder %s631_s13, %s627_s12 }
   0x9   : > { %s856_s22 = smov (%p26_p0, %s25_s22), 0  ;;  %s858_s23 = smov (!%p26_p0, %s28_s23), %s651_s18 }
   0xa   : > { %s101_s24 = ssub.s32 %s647_s17, %s856_s22  ;;  %p735_p3 = por %p116_p2, %p115_p1 }
   0xb   : > { %p30_p4 = scmp.ge.s32.totalorder %s858_s23, 2  ;;  %p122_p6 = scmp.eq.s32.totalorder %s422_s21, 3 }
   0xc   : > { %p425_p7 = scmp.ge.s32.totalorder %s655_s19, 1  ;;  %p154_p9 = scmp.lt.s32.totalorder %s655_s19, 5 }
   0xd   : > { %s860_s23 = smov (%p30_p4, %s858_s23), 0  ;;  %p744_p8 = por %p122_p6, %p121_p5 }
   0xe   : > { %s100_s27 = ssub.s32 %s651_s18, %s860_s23  ;;  %s105_s28 = sadd.s32 1, %s635_s14 }
   0xf   : > { %s102_s29 = sor.u32 %s101_s24, %s100_s27  ;;  %p155_p10 = pnand %p425_p7, %p154_p9 }
  0x10   : > { %p103_p11 = scmp.eq.s32.totalorder %s102_s29, 0  ;;  %p178_p12 = scmp.lt.s32.totalorder (!%p155_p10), %s643_s16, 1  ;;  %vm196_vm0 = vcmask (!%p155_p10), 1043456   ;;  %v229_v13 = vld [vmem:[%s843_s1] sm:$0xff] (!%p155_p10)  ;;  %vm243_vm1 = vcmask (!%p155_p10), 293888   ;;  %v659_v15 = vmov (!%p155_p10), 0  }
  0x11   : > { %158 = sbr.rel (%p155_p10) target bundleno = 397 (0x18d), region = 32  ;;  %s428_s4 = sshll.u32 (!%p155_p10), %s639_s15, 7  ;;  %455 = vmatprep.mubr.msk.f32.mxu0 (!%p155_p10), %vm243_vm1, %v229_v13  ;;  %v231_v14 = vld [vmem:[%s844_s2] sm:$0xff] (!%p155_p10)  ;;  %559 = vset.pattern.permute.xlu1 (!%p155_p10), %v659_v15  ;;  %v232_v16 = vld [vmem:[%s844_s2 + $0x8] sm:$0xff] (!%p155_p10)  ;;  %vm211_vm2 = vcmask (!%p155_p10), 1039360   ;;  %vm224_vm3 = vcmask (!%p155_p10), 1031168  }
  0x12   : > { %s753_s30 = scalar_select %p103_p11, %s635_s14, %s105_s28  }
  0x13   : > { %s184_s5 = sshra.s32 (!%p155_p10), %s428_s4, 7  ;;  %s657_s21 = smov (!%p155_p10), 126   ;;  %560 = vset.pattern.permute.xlu0 (!%p155_p10), %v659_v15  ;;  %v230_v35 = vld [vmem:[%s843_s1 + $0x8] sm:$0xff] (!%p155_p10) }
  0x14   : > { %s429_s8 = sshll.u32 (!%p155_p10), %s184_s5, 3  ;;  %s658_s24 = smov (!%p155_p10), 127  }
  0x15   : > { %s175_s9 = sand.u32 (!%p155_p10), 1, %s631_s13   ;;  %s660_s5 = smov (!%p155_p10), [#allocation2]  }
  0x16   : > { %s426_s10 = sshll.u32 (!%p155_p10), %s175_s9, 4 }
  0x18   : > { %s179_s6 = scalar_select %p178_p12, %s643_s16, 1 }
  0x1a   : > { %s466_s7 = smul.u32 48, %s179_s6  ;;  %s565_s6 = sshll.u32 %s660_s5, 4  ;;  %s566_s6 = int_to_ptr.vmem [resolvable:$false] %s565_s6 }
  0x1c   : > { %s182_s11 = scalar_lea.vmem %s842_s0, %s466_s7  ;;  %s567_s7 = scalar_lea.vmem %s566_s6, 512 }
  0x1d   : > { %s187_s20 = scalar_lea.vmem %s182_s11, %s429_s8  ;;  %s434_s11 = sshll.u32 %s643_s16, 2 }
  0x1e   : > { %v188_v0 = vld [vmem:[%s187_s20] sm:$0xff]  ;;  %v189_v1 = vld [vmem:[%s187_s20 + $0x8] sm:$0xff]  ;;  %v190_v2 = vld [vmem:[%s187_s20 + $0x18] sm:$0xf] }
  0x1f   : > { %v197_v3 = vrot.slane %v188_v0, 4  ;;  %v198_v4 = vrot.slane %v189_v1, 4  ;;  %v554_v5 = vpack.i.bf16 %v189_v1, %v188_v0  ;;  %v191_v6 = vld [vmem:[%s187_s20 + $0x20] sm:$0xf]  ;;  %v199_v7 = vrot.slane %v190_v2, 4  ;;  %s341_s20 = sadd.s32 %s639_s15, %s434_s11  ;;  %s790_s15 = scalar_lea.sflag [#allocation3], %s175_s9 }
  0x20   : > { %v201_v8 = vrot.slane %v191_v6, 4  ;;  %s435_s27 = sshll.u32 %s341_s20, 7 }
  0x21   : > { %v544_v9 = vpack.i.bf16 %v198_v4, %v197_v3  ;;  %555 = vrot.lane.b32.xlu1 %v554_v5, %s657_s21  ;;  %v200_v10 = vsel %vm196_vm0, %v197_v3, %v199_v7  ;;  %s788_s4 = scalar_lea.hbm %s845_s3, %s435_s27 }
  0x22   : > { %v202_v11 = vsel %vm196_vm0, %v198_v4, %v201_v8 }
  0x23   : > { %545 = vrot.lane.b32.xlu0 %v544_v9, %s658_s24  ;;  %v549_v12 = vpack.i.bf16 %v202_v11, %v200_v10 }
  0x25   : > { %220 = vrot.lane.b32.xlu1 %v190_v2, %s657_s21 }
  0x27   : > { %550 = vrot.lane.b32.xlu0 %v549_v12, %s658_s24 }
  0x29   : > { %235 = vperm.xlu1 %559, %v231_v14  }
  0x2b   : > { %222 = vrot.lane.b32.xlu0 %v191_v6, %s657_s21  ;;  %s177_s21 = scalar_lea.vmem [#allocation2], %s426_s10 }
  0x2c   : > { %s344_s24 = sshll.u32 %s177_s21, 4  ;;  %s783_s24 = int_to_ptr.vmem [resolvable:$true] %s344_s24 }
  0x2d   : > { %s561_s16 = scalar_lea.vmem %s783_s24, 256  ;;  %p568_p2 = scmp.lt.s32.totalorder %s783_s24, %s566_s6 }
  0x2e   : > { %p562_p13 = scmp.ne.s32.totalorder %s783_s24, %s561_s16  ;;  %p569_p4 = scmp.lt.s32.totalorder %s567_s7, %s561_s16 }
  0x2f   : > { %240 = vperm.xlu0 %560, %v232_v16  }
  0x30   : > { %p563_p0 = pnand %p562_p13, %p735_p3  ;;  %p570_p5 = por %p569_p4, %p568_p2 }
  0x32   : > { %p564_p1 = pneg %p563_p0 }
  0x34   : > { %p571_p6 = pnand %p570_p5, %p564_p1 }
  0x93   : > { %v556_v17 = vpop.permute.xlu1 %555 }
  0x94   : > { %v558_v21 = vunpack.i.h.bf16 %v556_v17  ;;  %v557_v22 = vunpack.i.l.bf16 %v556_v17 }
  0x95   : > { %v546_v18 = vpop.permute.xlu0 %545 }
  0x96   : > { %v548_v19 = vunpack.i.h.bf16 %v546_v18  ;;  %v547_v20 = vunpack.i.l.bf16 %v546_v18  ;;  %v225_v29 = vsel %vm224_vm3, %v557_v22, %v558_v21 }
  0x97   : > { %v221_v31 = vpop.permute.xlu1 %220 }
  0x98   : > { %v212_v23 = vsel %vm211_vm2, %v547_v20, %v548_v19 }
  0x99   : > { %v551_v24 = vpop.permute.xlu0 %550  ;;  %v228_v25 = vsel %vm196_vm0, %v190_v2, %v212_v23 }
  0x9a   : > { %v553_v26 = vunpack.i.h.bf16 %v551_v24  ;;  %v552_v27 = vunpack.i.l.bf16 %v551_v24  ;;  %v458_v28 = vpack.c.bf16 %v228_v25, %v188_v0 }
  0x9c   : > { %459 = vmatprep.subr.bf16.mxu0 %v458_v28  ;;  %v213_v30 = vsel %vm211_vm2, %v552_v27, %v553_v26 }
  0x9d   : > { %461 = vmatpush3.bf16.msra.mxu0 %v458_v28  ;;  %v462_v32 = vpack.c.bf16 %v225_v29, %v213_v30  ;;  %v223_v33 = vpop.permute.xlu0 %222 }
  0x9e   : > { %v226_v34 = vsel %vm224_vm3, %v221_v31, %v223_v33 }
  0x9f   : > { %463 = vmatprep.subr.bf16.mxu0 %v462_v32 }
  0xa1   : > { %465 = vmatpush3.bf16.msra.mxu0 %v462_v32 }
  0xa2   : > { %453 = vmatprep.subr.msk.mxu0 %vm196_vm0, %v226_v34 }
  0xa5   : > { %454 = vmatpush3.msk.msra.mxu0 %vm196_vm0, %v226_v34 }
  0xa6   : > { %456 = vmatmul.mubr.msk.f32.vlgmr.msra.gmra.mrb[0].mxu0 %vm243_vm1, %v230_v35 }
  0xa8   : > { %v236_v37 = vpop.permute.xlu1 %235 }
  0xae   : > { %v241_v36 = vpop.permute.xlu0 %240 }
 0x179   : > { %v457_v38 = vpop.f32.mrb[0].mxu0 }
 0x17a   : > { %v324_v39 = vadd.f32 %v457_v38, %v241_v36  ;;  %v318_v40 = vpop.f32.mrb[1].mxu0 }
 0x17b   : > { %v319_v41 = vadd.f32 %v318_v40, %v236_v37 }
 0x17c   : > { %328 = vst [vmem:[%s177_s21 + $0x8] sm:$0xff] %v324_v39 }
 0x17d   : > { %327 = vst [vmem:[%s177_s21] sm:$0xff] %v319_v41 }
 0x17e   : > { %574 = shalt.err (!%p571_p6)
}
 0x17f   : > { %s575_s8 = scalar_lea.hbm %s788_s4, 256  ;;  %s579_s11 = scalar_lea.hbm %s845_s3, 1024 }
 0x180   : > { %p576_p7 = scmp.ne.s32.totalorder %s788_s4, %s575_s8  ;;  %p580_p11 = scmp.lt.u32.totalorder %s788_s4, %s845_s3 }
 0x181   : > { %p581_p12 = scmp.lt.u32.totalorder %s579_s11, %s575_s8  ;;  %p583_p0 = scmp.lt.u32.totalorder %s575_s8, %s788_s4 }
 0x182   : > { %p577_p9 = pnand %p576_p7, %p735_p3 }
 0x183   : > { %p582_p13 = por %p581_p12, %p580_p11 }
 0x184   : > { %p578_p10 = pneg %p577_p9 }
 0x185   : > { %p584_p1 = por %p583_p0, %p582_p13 }
 0x187   : > { %p585_p2 = pnand %p584_p1, %p578_p10 }
 0x189   : > { %588 = shalt.err (!%p585_p2)
}
 0x18a   : > { %s661_s27 = smov 128   ;;  %s662_s28 = smov 256  }
 0x18b   : > { %s663_s29 = smov 8  }
 0x18c   : > { %467 = dma.vmem_to_hbm [thread:$0]  (%p735_p3), %s783_s24, 256, %s788_s4, %s790_s15, %s661_s27, %s662_s28, %s663_s29  }
 0x18d PF: > { %p473_p4 = scmp.ge.s32.totalorder %s655_s19, 2  ;;  %s359_s16 = sand.u32 1, %s627_s12  }
 0x18e   : > { %s360_s5 = scalar_lea.sflag [#allocation3], %s359_s16 }
 0x18f   : > { %p470_p5 = pnand %p473_p4, %p744_p8 }
 0x191   : > { %622 = dma.done.wait (!%p470_p5), %s360_s5, 256  }
 0x192   : > { %624 = vsyncadd (!%p470_p5), %s360_s5, 4294967040  ;;  %s16_s19 = sadd.s32 1, %s655_s19   ;;  %s848_s12 = smov %s631_s13 }
 0x193   : > { %p13_p6 = scmp.ge.s32.totalorder %s16_s19, 6   ;;  %s849_s13 = smov %s635_s14 }
 0x194   : > { %s850_s14 = smov %s753_s30  ;;  %s851_s15 = smov %s647_s17 }
 0x195   : > { %s852_s16 = smov %s651_s18  ;;  %s853_s17 = smov %s856_s22 }
 0x196   : > { %s854_s18 = smov %s860_s23  ;;  %15 = sbr.rel (!%p13_p6) target bundleno = 5 (0x5), region = 68 }
 0x19d   :  { %365 = vsyncpa [#allocation3], 1 }
 0x19e   :  { %367 = vsyncpa [#allocation3 + $0x1], 1 }

</bundles_post_ra>
